<compile_context>
chip_gen: v7x
topology: tpu7x:2x2x1
jax: 0.10.0
libtpu: 0.0.40
codegen_flags: <defaults>
</compile_context>

<pallas_src>
import numpy as np
import jax
import jax.numpy as jnp
from jax.experimental import pallas as pl
from jax.experimental.pallas import tpu as pltpu

_LANE = 128
_MAX_TILE_ROWS = 1024   # 1024 * 128 * 4B = 512 KiB per f32 input tile


def _cdiv(a, b):
    return -(-a // b)


def _round_up(a, m):
    return _cdiv(a, m) * m


def _mse_fused_kernel(tile_comp_ref, tile_first_ref, tile_last_ref,
                      inv_count_ref, labels_ref, preds_ref, out_ref, acc_ref):
    t = pl.program_id(0)

    # Partial sum of squared differences for this tile (upcast to f32 in VMEM).
    diff = labels_ref[...].astype(jnp.float32) - preds_ref[...].astype(jnp.float32)
    partial = jnp.sum(diff * diff)

    # Reset the running-sum accumulator at the first tile of each component.
    @pl.when(tile_first_ref[t] == 1)
    def _():
        acc_ref[...] = jnp.zeros_like(acc_ref)

    acc_ref[...] += partial

    # At the last tile of a component: mean = sum * (1 / true_count) -> output.
    @pl.when(tile_last_ref[t] == 1)
    def _():
        c = tile_comp_ref[t]
        out_ref[c] = jnp.sum(acc_ref[...] * inv_count_ref[c])


def mse_loss(n_components, *components):
    """Pallas equivalent of MSELoss.forward.

    Args:
      n_components: number of (label, pred) pairs.
      *components: 2*n_components arrays; first half labels, second half preds.
    Returns:
      float32 vector of shape (n_components,) with per-component MSE.
    """
    assert len(components) == 2 * n_components, \
        "Number of loss components should be even."
    labels = components[:n_components]
    preds = components[n_components:]

    # Common slab dtype: no cast when all components already share a dtype
    # (the common case); keeps bf16 inputs bf16 through the DMA.
    slab_dtype = jnp.result_type(*[x.dtype for x in components])

    counts = [int(np.prod(labels[i].shape)) for i in range(n_components)]
    rows = [_round_up(max(_cdiv(n, _LANE), 1), 8) for n in counts]
    tile_rows = min(_MAX_TILE_ROWS, _round_up(max(rows), 8))
    rows_padded = [_round_up(r, tile_rows) for r in rows]
    tiles = [rp // tile_rows for rp in rows_padded]
    total_tiles = int(sum(tiles))

    def _to_slab(x, rp):
        flat = jnp.ravel(x).astype(slab_dtype)
        pad = rp * _LANE - flat.size
        if pad:
            flat = jnp.concatenate([flat, jnp.zeros((pad,), dtype=slab_dtype)])
        return flat.reshape(rp, _LANE)

    label_slab = jnp.concatenate(
        [_to_slab(labels[i], rows_padded[i]) for i in range(n_components)], axis=0)
    pred_slab = jnp.concatenate(
        [_to_slab(preds[i], rows_padded[i]) for i in range(n_components)], axis=0)

    # Per-tile metadata (scalar-prefetched into SMEM).
    tc, tf, tl = [], [], []
    for i in range(n_components):
        nt = tiles[i]
        f = np.zeros((nt,), np.int32)
        l = np.zeros((nt,), np.int32)
        f[0] = 1
        l[-1] = 1
        tc.append(np.full((nt,), i, np.int32))
        tf.append(f)
        tl.append(l)
    tile_comp = jnp.asarray(np.concatenate(tc))
    tile_first = jnp.asarray(np.concatenate(tf))
    tile_last = jnp.asarray(np.concatenate(tl))
    inv_count = jnp.asarray(np.array([1.0 / c for c in counts], np.float32))

    out = pl.pallas_call(
        _mse_fused_kernel,
        out_shape=jax.ShapeDtypeStruct((n_components,), jnp.float32),
        grid_spec=pltpu.PrefetchScalarGridSpec(
            num_scalar_prefetch=3,
            grid=(total_tiles,),
            in_specs=[
                pl.BlockSpec(memory_space=pltpu.SMEM),              # inv_count
                pl.BlockSpec((tile_rows, _LANE),
                             lambda t, tcr, tfr, tlr: (t, 0)),      # labels slab
                pl.BlockSpec((tile_rows, _LANE),
                             lambda t, tcr, tfr, tlr: (t, 0)),      # preds slab
            ],
            out_specs=pl.BlockSpec(memory_space=pltpu.SMEM),
            scratch_shapes=[pltpu.VMEM((1, 1), jnp.float32)],
        ),
        compiler_params=pltpu.CompilerParams(
            # Accumulator is carried across tiles -> reduction axis is arbitrary.
            dimension_semantics=("arbitrary",),
        ),
    )(tile_comp, tile_first, tile_last, inv_count, label_slab, pred_slab)
    # TODO(synk): on v7x, add a leading "parallel" grid axis that splits each
    # component's tiles across the 2 TensorCores (per-core partial sums combined
    # in the wrapper) to use both cores' HBM paths.
    return out


if __name__ == "__main__":
    key = jax.random.PRNGKey(0)
    k1, k2, k3, k4 = jax.random.split(key, 4)

    n_components = 2
    # Component 0: NCHW conv-style activation; component 1: (batch, seq, hidden).
    label0 = jax.random.normal(k1, (2, 4, 16, 16), dtype=jnp.float32)
    label1 = jax.random.normal(k2, (2, 8, 32), dtype=jnp.float32)
    pred0 = jax.random.normal(k3, (2, 4, 16, 16), dtype=jnp.float32)
    pred1 = jax.random.normal(k4, (2, 8, 32), dtype=jnp.float32)

    losses = mse_loss(n_components, label0, label1, pred0, pred1)
    losses = jax.block_until_ready(losses)

    # Reference check in plain JAX.
    ref = jnp.stack([
        jnp.mean(jnp.square(label0 - pred0)),
        jnp.mean(jnp.square(label1 - pred1)),
    ])
    assert losses.shape == (n_components,)
    assert jnp.allclose(losses, ref, rtol=1e-5, atol=1e-5)
    print("KERNEL_OK")
</pallas_src>

<mosaic_0001>
module attributes {stable_mosaic.version = 11 : i64} {
  func.func @_mse_fused_kernel(%arg0: i32, %arg1: memref<2xi32, #tpu.memory_space<smem>>, %arg2: memref<2xi32, #tpu.memory_space<smem>>, %arg3: memref<2xi32, #tpu.memory_space<smem>>, %arg4: memref<2xf32, #tpu.memory_space<smem>>, %arg5: memref<16x128xf32, #tpu.memory_space<vmem>>, %arg6: memref<16x128xf32, #tpu.memory_space<vmem>>, %arg7: memref<2xf32, #tpu.memory_space<smem>>, %arg8: memref<1x1xf32, #tpu.memory_space<vmem>>) attributes {dimension_semantics = [#tpu.dimension_semantics<arbitrary>], iteration_bounds = array<i64: 2>, scalar_prefetch = 3 : i64, scratch_operands = 1 : i64, tpu.core_type = #tpu.core_type<tc>, window_params = [{transform_indices = @transform_0, window_bounds = array<i64: 2>}, {transform_indices = @transform_1, window_bounds = array<i64: 16, 128>}, {transform_indices = @transform_2, window_bounds = array<i64: 16, 128>}, {transform_indices = @transform_3, window_bounds = array<i64: 2>}]} {
    %c0 = arith.constant 0 : index
    %c0_0 = arith.constant 0 : index
    %0 = vector.load %arg5[%c0, %c0_0] : memref<16x128xf32, #tpu.memory_space<vmem>>, vector<16x128xf32>
    %c0_1 = arith.constant 0 : index
    %c0_2 = arith.constant 0 : index
    %1 = vector.load %arg6[%c0_1, %c0_2] : memref<16x128xf32, #tpu.memory_space<vmem>>, vector<16x128xf32>
    %2 = arith.subf %0, %1 : vector<16x128xf32>
    %3 = arith.mulf %2, %2 : vector<16x128xf32>
    %4 = vector.shape_cast %3 : vector<16x128xf32> to vector<1x16x128xf32>
    %cst = arith.constant dense<0.000000e+00> : vector<1xf32>
    %5 = vector.multi_reduction <add>, %4, %cst [1, 2] : vector<1x16x128xf32> to vector<1xf32>
    %6 = vector.shape_cast %5 : vector<1xf32> to vector<1x1x1xf32>
    %7 = vector.extract %6[0, 0, 0] : f32 from vector<1x1x1xf32>
    %8 = arith.index_cast %arg0 : i32 to index
    %9 = memref.load %arg2[%8] : memref<2xi32, #tpu.memory_space<smem>>
    %c1_i32 = arith.constant 1 : i32
    %10 = arith.cmpi eq, %9, %c1_i32 : i32
    %11 = arith.extui %10 : i1 to i32
    %c0_i32 = arith.constant 0 : i32
    %12 = arith.cmpi ne, %11, %c0_i32 : i32
    scf.if %12 {
      %cst_9 = arith.constant 0.000000e+00 : f32
      %22 = vector.broadcast %cst_9 : f32 to vector<1x1xf32>
      %c0_10 = arith.constant 0 : index
      %c0_11 = arith.constant 0 : index
      %23 = vector.load %arg8[%c0_10, %c0_11] : memref<1x1xf32, #tpu.memory_space<vmem>>, vector<1x1xf32>
      tpu.vector_store %arg8[%c0_10, %c0_11], %22 {strides = array<i32>} : memref<1x1xf32, #tpu.memory_space<vmem>>, vector<1x1xf32>,
    } else {
    }
    %c0_3 = arith.constant 0 : index
    %c0_4 = arith.constant 0 : index
    %13 = vector.load %arg8[%c0_3, %c0_4] : memref<1x1xf32, #tpu.memory_space<vmem>>, vector<1x1xf32>
    %14 = vector.broadcast %7 : f32 to vector<1x1xf32>
    %15 = arith.addf %13, %14 : vector<1x1xf32>
    %c0_5 = arith.constant 0 : index
    %c0_6 = arith.constant 0 : index
    %16 = vector.load %arg8[%c0_5, %c0_6] : memref<1x1xf32, #tpu.memory_space<vmem>>, vector<1x1xf32>
    tpu.vector_store %arg8[%c0_5, %c0_6], %15 {strides = array<i32>} : memref<1x1xf32, #tpu.memory_space<vmem>>, vector<1x1xf32>,
    %17 = arith.index_cast %arg0 : i32 to index
    %18 = memref.load %arg3[%17] : memref<2xi32, #tpu.memory_space<smem>>
    %c1_i32_7 = arith.constant 1 : i32
    %19 = arith.cmpi eq, %18, %c1_i32_7 : i32
    %20 = arith.extui %19 : i1 to i32
    %c0_i32_8 = arith.constant 0 : i32
    %21 = arith.cmpi ne, %20, %c0_i32_8 : i32
    scf.if %21 {
      %22 = arith.index_cast %arg0 : i32 to index
      %23 = memref.load %arg1[%22] : memref<2xi32, #tpu.memory_space<smem>>
      %c0_9 = arith.constant 0 : index
      %c0_10 = arith.constant 0 : index
      %24 = vector.load %arg8[%c0_9, %c0_10] : memref<1x1xf32, #tpu.memory_space<vmem>>, vector<1x1xf32>
      %25 = arith.index_cast %23 : i32 to index
      %26 = memref.load %arg4[%25] : memref<2xf32, #tpu.memory_space<smem>>
      %27 = vector.broadcast %26 : f32 to vector<1x1xf32>
      %28 = arith.mulf %24, %27 : vector<1x1xf32>
      %29 = vector.shape_cast %28 : vector<1x1xf32> to vector<1x1x1xf32>
      %cst_11 = arith.constant dense<0.000000e+00> : vector<1xf32>
      %30 = vector.multi_reduction <add>, %29, %cst_11 [1, 2] : vector<1x1x1xf32> to vector<1xf32>
      %31 = vector.shape_cast %30 : vector<1xf32> to vector<1x1x1xf32>
      %32 = vector.extract %31[0, 0, 0] : f32 from vector<1x1x1xf32>
      %33 = arith.index_cast %23 : i32 to index
      %34 = memref.load %arg7[%33] : memref<2xf32, #tpu.memory_space<smem>>
      memref.store %32, %arg7[%33] : memref<2xf32, #tpu.memory_space<smem>>
    } else {
    }
    return
  }
  func.func @transform_0(%arg0: i32, %arg1: memref<2xi32, #tpu.memory_space<smem>>, %arg2: memref<2xi32, #tpu.memory_space<smem>>, %arg3: memref<2xi32, #tpu.memory_space<smem>>) -> i32 {
    %c0_i32 = arith.constant 0 : i32
    %c0_i32_0 = arith.constant 0 : i32
    return %c0_i32 : i32
  }
  func.func @transform_1(%arg0: i32, %arg1: memref<2xi32, #tpu.memory_space<smem>>, %arg2: memref<2xi32, #tpu.memory_space<smem>>, %arg3: memref<2xi32, #tpu.memory_space<smem>>) -> (i32, i32) {
    %c0_i32 = arith.constant 0 : i32
    %c0_i32_0 = arith.constant 0 : i32
    return %arg0, %c0_i32 : i32, i32
  }
  func.func @transform_2(%arg0: i32, %arg1: memref<2xi32, #tpu.memory_space<smem>>, %arg2: memref<2xi32, #tpu.memory_space<smem>>, %arg3: memref<2xi32, #tpu.memory_space<smem>>) -> (i32, i32) {
    %c0_i32 = arith.constant 0 : i32
    %c0_i32_0 = arith.constant 0 : i32
    return %arg0, %c0_i32 : i32, i32
  }
  func.func @transform_3(%arg0: i32, %arg1: memref<2xi32, #tpu.memory_space<smem>>, %arg2: memref<2xi32, #tpu.memory_space<smem>>, %arg3: memref<2xi32, #tpu.memory_space<smem>>) -> i32 {
    %c0_i32 = arith.constant 0 : i32
    %c0_i32_0 = arith.constant 0 : i32
    return %c0_i32 : i32
  }
}

</mosaic_0001>

<bundles_post_ra>
// kernel: tpu_custom_call.1
= control target key start
LH: loop header
LB: loop body
LE: loop exit
PB: predicated region body
PF: predicated region fallthrough
CT: control target
= control target key end

     0   :  { %s910_s0 = inlined_call_operand.hbm [shape: s32[2], index: 0, kind: input, shape index: {}]   ;;  %s911_s3 = inlined_call_operand.vmem [shape: f32[2], index: 3, kind: input, shape index: {}]   ;;  %s912_s4 = inlined_call_operand.hbm [shape: f32[32,128], index: 4, kind: input, shape index: {}]   ;;  %s913_s5 = inlined_call_operand.hbm [shape: f32[32,128], index: 5, kind: input, shape index: {}]   ;;  %s914_s6 = inlined_call_operand.hbm [shape: f32[2], index: 6, kind: output, shape index: {}]   ;;  %s915_s1 = inlined_call_operand.vmem [shape: s32[2], index: 1, kind: input, shape index: {}]   ;;  %s916_s2 = inlined_call_operand.vmem [shape: s32[2], index: 2, kind: input, shape index: {}]  }
   0x1   :  { %s478_s23 = scalar_lea.hbm %s910_s0, 16 }
   0x2   :  { %p479_p0 = scmp.ne.s32.totalorder %s910_s0, %s478_s23  ;;  %p482_p1 = scmp.lt.u32.totalorder %s478_s23, %s910_s0 }
   0x4   :  { %p484_p2 = pnand %p482_p1, %p479_p0 }
   0x6   :  { %487 = shalt.err (!%p484_p2)  }
   0x7   :  { %s649_s28 = smov [#allocation4]   ;;  %s13_s9 = sshll.u32 %s915_s1, 4  ;;  %s14_s9 = int_to_ptr.vmem [resolvable:$true] %s13_s9 }
   0x8   :  { %12 = dma.hbm_to_smem %s910_s0, 16, %s649_s28, [#allocation3] }
   0x9   :  { %s17_s12 = sshll.u32 %s916_s2, 4  ;;  %s488_s13 = scalar_lea.vmem %s14_s9, 16  ;;  %s18_s12 = int_to_ptr.vmem [resolvable:$true] %s17_s12 }
   0xa   :  { %p489_p3 = scmp.ne.s32.totalorder %s14_s9, %s488_s13  ;;  %p493_p4 = scmp.lt.s32.totalorder %s14_s9, %s14_s9 }
   0xb   :  { %p494_p5 = scmp.lt.s32.totalorder %s488_s13, %s488_s13 }
   0xd   :  { %p495_p6 = por %p494_p5, %p493_p4 }
   0xf   :  { %p496_p7 = pnand %p495_p6, %p489_p3 }
  0x11   :  { %499 = shalt.err (!%p496_p7)  }
  0x12   :  { %s650_s14 = smov [#allocation5]   ;;  %s500_s0 = scalar_lea.vmem %s18_s12, 16 }
  0x13   :  { %16 = dma.vmem_to_smem %s14_s9, 16, %s650_s14, [#allocation3] }
  0x14   :  { %p501_p8 = scmp.ne.s32.totalorder %s18_s12, %s500_s0  ;;  %p505_p9 = scmp.lt.s32.totalorder %s18_s12, %s18_s12 }
  0x15   :  { %p506_p10 = scmp.lt.s32.totalorder %s500_s0, %s500_s0 }
  0x17   :  { %p507_p11 = por %p506_p10, %p505_p9 }
  0x19   :  { %p508_p12 = pnand %p507_p11, %p501_p8 }
  0x1b   :  { %511 = shalt.err (!%p508_p12)  }
  0x1c   :  { %s651_s1 = smov [#allocation6]  }
  0x1d   :  { %20 = dma.vmem_to_smem %s18_s12, 16, %s651_s1, [#allocation3] }
  0x1e   :  { %615 = dma.done.wait [#allocation3], 48 }
  0x1f   :  { %616 = vsyncadd [#allocation3], 4294967248 }
  0x20   :  { %22 = sfence }
  0x21   :  { %23 = vsyncpa [#allocation10], 0 }
  0x22   :  { %24 = vsyncpa [#allocation8], 0 }
  0x23   :  { %26 = vsyncpa [#allocation8 + $0x1], 0 }
  0x24   :  { %27 = vsyncpa [#allocation13], 0 }
  0x25   :  { %29 = vsyncpa [#allocation13 + $0x1], 0 }
  0x26   :  { %30 = vsyncpa [#allocation9], 0  ;;  %s712_s2 = smov 0   ;;  %s714_s15 = smov 0  }
  0x27   :  { %s716_s16 = smov 0   ;;  %s718_s17 = smov 0  }
  0x28 LB: > { %s731_s18 = sadd.s32 4294967295, %s647_s17   ;;  %s734_s19 = sadd.s32 1, %s647_s17   ;;  %s647_s17 = sphi %s718_s17, %s928_s17   ;;  %s643_s16 = sphi %s716_s16, %s927_s16   ;;  %s639_s15 = sphi %s714_s15, %s926_s15   ;;  %s635_s2 = sphi %s712_s2, %s925_s2  }
  0x29   : > { %s61_s20 = ssub.s32 %s647_s17, %s734_s19  ;;  %s64_s21 = sadd.s32 1, %s643_s16 }
  0x2a   : > { %p62_p13 = scmp.eq.s32.totalorder %s61_s20, 0  ;;  %p71_p0 = scmp.ne.s32.totalorder %s643_s16, %s639_s15 }
  0x2b   : > { %p72_p1 = scmp.eq.s32.totalorder %s647_s17, 0  ;;  %p77_p2 = scmp.ne.s32.totalorder %s639_s15, %s635_s2 }
  0x2c   : > { %s744_s22 = scalar_select %p62_p13, %s643_s16, %s64_s21  }
  0x2d   : > { %p73_p3 = por %p72_p1, %p71_p0  ;;  %p78_p4 = scmp.eq.s32.totalorder %s731_s18, 0 }
  0x2e   : > { %p385_p5 = scmp.ge.s32.totalorder %s647_s17, 1  ;;  %p135_p6 = scmp.lt.s32.totalorder %s647_s17, 3 }
  0x2f   : > { %p751_p7 = por %p78_p4, %p77_p2  ;;  %s148_s27 = sshll.u32 %s911_s3, 4  ;;  %s149_s27 = int_to_ptr.vmem [resolvable:$true] %s148_s27 }
  0x30   : > { %p755_p8 = pnand %p385_p5, %p135_p6  ;;  %p434_p10 = scmp.lt.s32.totalorder %s647_s17, 2 }
  0x31   : > { %s919_s23 = scalar_select %p751_p7, 1, 0 }
  0x32   : > { %s920_s24 = scalar_select %p755_p8, 1, 0 }
  0x33   : > { %p422_p9 = pneg %p755_p8  ;;  %s766_s28 = sand.u32 1, %s643_s16  }
  0x34   : > { %p774_p12 = pnand %p434_p10, %p73_p3  ;;  %s388_s7 = sshll.u32 %s766_s28, 4 }
  0x35   : > { %p770_p11 = pnand %p422_p9, %p78_p4  ;;  %s512_s8 = scalar_lea.vmem %s149_s27, 16 }
  0x36   : > { %p513_p13 = scmp.ne.s32.totalorder %s149_s27, %s512_s8  ;;  %p520_p5 = scmp.lt.s32.totalorder %s149_s27, %s149_s27 }
  0x37   : > { %p514_p0 = pneg %p770_p11  ;;  %p521_p6 = scmp.lt.s32.totalorder %s512_s8, %s512_s8 }
  0x39   : > { %p515_p1 = pnand %p514_p0, %p513_p13  ;;  %p522_p7 = por %p521_p6, %p520_p5 }
  0x3b   : > { %p516_p2 = pneg %p515_p1 }
  0x3d   : > { %p523_p8 = pnand %p522_p7, %p516_p2 }
  0x3f   : > { %526 = shalt.err (!%p523_p8)
}
  0x40   : > { %s652_s9 = smov [#allocation7]   ;;  %s404_s10 = sshll.u32 %s647_s17, 8 }
  0x41   : > { %425 = dma.vmem_to_smem (!%p770_p11), %s149_s27, 16, %s652_s9, [#allocation10]  }
  0x42   : > { %s789_s13 = scalar_lea.hbm %s912_s4, %s404_s10  ;;  %s163_s14 = scalar_lea.vmem [#allocation11], %s388_s7 }
  0x43   : > { %s170_s0 = sshll.u32 %s163_s14, 4  ;;  %s160_s1 = scalar_lea.sflag [#allocation8], %s766_s28  ;;  %s793_s0 = int_to_ptr.vmem [resolvable:$true] %s170_s0 }
  0x44   : > { %s527_s2 = scalar_lea.hbm %s789_s13, 256  ;;  %p529_p7 = pneg %p774_p12 }
  0x45   : > { %p528_p3 = scmp.ne.s32.totalorder %s789_s13, %s527_s2  ;;  %s532_s25 = scalar_lea.hbm %s912_s4, 512 }
  0x46   : > { %p533_p10 = scmp.lt.u32.totalorder %s789_s13, %s912_s4  ;;  %p534_p11 = scmp.lt.u32.totalorder %s532_s25, %s527_s2 }
  0x47   : > { %p530_p8 = pnand %p529_p7, %p528_p3  ;;  %p536_p0 = scmp.lt.u32.totalorder %s527_s2, %s789_s13 }
  0x48   : > { %p535_p13 = por %p534_p11, %p533_p10 }
  0x49   : > { %p531_p9 = pneg %p530_p8 }
  0x4a   : > { %p537_p1 = por %p536_p0, %p535_p13 }
  0x4c   : > { %p538_p2 = pnand %p537_p1, %p531_p9 }
  0x4e   : > { %541 = shalt.err (!%p538_p2)
}
  0x4f   : > { %s542_s29 = scalar_lea.vmem %s793_s0, 256  ;;  %s653_s8 = smov [#allocation11]  }
  0x50   : > { %p543_p5 = scmp.ne.s32.totalorder %s793_s0, %s542_s29  ;;  %s547_s9 = sshll.u32 %s653_s8, 4  ;;  %s548_s9 = int_to_ptr.vmem [resolvable:$false] %s547_s9 }
  0x51   : > { %s549_s11 = scalar_lea.vmem %s548_s9, 512  ;;  %p550_p8 = scmp.lt.s32.totalorder %s793_s0, %s548_s9 }
  0x52   : > { %p545_p6 = pnand %p543_p5, %p529_p7  ;;  %p551_p10 = scmp.lt.s32.totalorder %s549_s11, %s542_s29 }
  0x54   : > { %p546_p3 = pneg %p545_p6  ;;  %p552_p11 = por %p551_p10, %p550_p8 }
  0x56   : > { %p553_p13 = pnand %p552_p11, %p546_p3 }
  0x58   : > { %556 = shalt.err (!%p553_p13)
}
  0x59   : > { %s654_s12 = smov 128   ;;  %s655_s14 = smov 8  }
  0x5a   : > { %429 = dma.hbm_to_vmem [thread:$0]  (!%p774_p12), %s789_s13, 256, %s793_s0, %s160_s1, %s654_s12, %s654_s12, %s655_s14  }
  0x5b   : > { %s831_s21 = scalar_lea.hbm %s913_s5, %s404_s10  ;;  %s184_s25 = scalar_lea.vmem [#allocation12], %s388_s7 }
  0x5c   : > { %s191_s26 = sshll.u32 %s184_s25, 4  ;;  %s181_s27 = scalar_lea.sflag [#allocation13], %s766_s28  ;;  %s835_s26 = int_to_ptr.vmem [resolvable:$true] %s191_s26 }
  0x5d   : > { %s557_s29 = scalar_lea.hbm %s831_s21, 256  ;;  %s562_s10 = scalar_lea.hbm %s913_s5, 512 }
  0x5e   : > { %p558_p9 = scmp.ne.s32.totalorder %s831_s21, %s557_s29  ;;  %p563_p2 = scmp.lt.u32.totalorder %s831_s21, %s913_s5 }
  0x5f   : > { %p564_p5 = scmp.lt.u32.totalorder %s562_s10, %s557_s29  ;;  %p566_p3 = scmp.lt.u32.totalorder %s557_s29, %s831_s21 }
  0x60   : > { %p560_p0 = pnand %p558_p9, %p529_p7 }
  0x61   : > { %p565_p6 = por %p564_p5, %p563_p2 }
  0x62   : > { %p561_p1 = pneg %p560_p0 }
  0x63   : > { %p567_p8 = por %p566_p3, %p565_p6 }
  0x65   : > { %p568_p10 = pnand %p567_p8, %p561_p1 }
  0x67   : > { %571 = shalt.err (!%p568_p10)
}
  0x68   : > { %s572_s7 = scalar_lea.vmem %s835_s26, 256  ;;  %s656_s8 = smov [#allocation12]  }
  0x69   : > { %p573_p11 = scmp.ne.s32.totalorder %s835_s26, %s572_s7  ;;  %s577_s9 = sshll.u32 %s656_s8, 4  ;;  %s578_s9 = int_to_ptr.vmem [resolvable:$false] %s577_s9 }
  0x6a   : > { %s579_s11 = scalar_lea.vmem %s578_s9, 512  ;;  %p580_p0 = scmp.lt.s32.totalorder %s835_s26, %s578_s9 }
  0x6b   : > { %p575_p13 = pnand %p573_p11, %p529_p7  ;;  %p581_p2 = scmp.lt.s32.totalorder %s579_s11, %s572_s7 }
  0x6d   : > { %p576_p9 = pneg %p575_p13  ;;  %p582_p5 = por %p581_p2, %p580_p0 }
  0x6f   : > { %p583_p6 = pnand %p582_p5, %p576_p9 }
  0x71   : > { %586 = shalt.err (!%p583_p6)
}
  0x72   : > { %432 = dma.hbm_to_vmem [thread:$0]  (!%p774_p12), %s831_s21, 256, %s835_s26, %s181_s27, %s654_s12, %s654_s12, %s655_s14  }
  0x73   : > { %p923_p7 = scmp.ne.s32.totalorder %s920_s24, 0 }
  0x75   : > { %203 = sbr.rel (%p923_p7) target bundleno = 433 (0x1b1), region = 32 }
  0x7c   : > { %618 = dma.done.wait (%p78_p4), [#allocation10], 16  }
  0x7d   : > { %620 = vsyncadd (%p78_p4), [#allocation10], 4294967280  ;;  %s209_s30 = sand.u32 1, %s639_s15   ;;  %p924_p1 = scmp.ne.s32.totalorder %s919_s23, 0 }
  0x7e   : > { %s396_s2 = sshll.u32 %s209_s30, 4  ;;  %s210_s20 = scalar_lea.sflag [#allocation8], %s209_s30 }
  0x7f   : > { %s213_s25 = scalar_lea.vmem [#allocation11], %s396_s2 }
  0x80   : > { %622 = dma.done.wait (%p924_p1), %s210_s20, 256  }
  0x81   : > { %624 = vsyncadd (%p924_p1), %s210_s20, 4294967040  ;;  %s219_s24 = scalar_lea.sflag [#allocation13], %s209_s30  ;;  %s222_s28 = scalar_lea.vmem [#allocation12], %s396_s2 }
  0x82   : > { %626 = dma.done.wait (%p924_p1), %s219_s24, 256  }
  0x83   : > { %628 = vsyncadd (%p924_p1), %s219_s24, 4294967040 }
  0x84   : > { %227 = sfence }
  0x85   : > { %v248_v0 = vld [vmem:[%s213_s25] sm:$0xff]  ;;  %v249_v1 = vld [vmem:[%s213_s25 + $0x8] sm:$0xff]  ;;  %s266_s12 = sld [smem:[#allocation5 + %s731_s18]] }
  0x86   : > { %v250_v2 = vld [vmem:[%s222_s28] sm:$0xff]  ;;  %v251_v3 = vld [vmem:[%s222_s28 + $0x8] sm:$0xff] }
  0x87   : > { %v252_v4 = vsub.f32 %v248_v0, %v250_v2  ;;  %v253_v5 = vsub.f32 %v249_v1, %v251_v3 }
  0x89   : > { %v254_v6 = vmul.f32 %v252_v4, %v252_v4  ;;  %v255_v7 = vmul.f32 %v253_v5, %v253_v5 }
  0x8b   : > { %v256_v8 = vadd.f32 %v255_v7, %v254_v6  ;;  %p398_p4 = scmp.ne.s32.totalorder %s266_s12, 1 }
  0x8c   : > { %vm271_vm0 = vcmask (!%p398_p4), 0   ;;  %v657_v16 = vmov (!%p398_p4), 0.0  }
  0x8d   : > { %257 = vadd.xlane.f32.xlu0 %v256_v8  ;;  %272 = vst.msk [vmem:[#allocation2] sm:$0x1] (!%p398_p4), %vm271_vm0, %v657_v16 }
 0x11a   : > { %v258_v9 = vpop.xlane.xlu0 %257 }
 0x11b   : > { %v259_v10 = vrot.slane %v258_v9, 4 }
 0x11d   : > { %v260_v11 = vadd.f32 %v259_v10, %v258_v9 }
 0x11f   : > { %v261_v12 = vrot.slane %v260_v11, 2 }
 0x121   : > { %v262_v13 = vadd.f32 %v261_v12, %v260_v11 }
 0x123   : > { %v263_v14 = vrot.slane %v262_v13, 1 }
 0x125   : > { %v264_v15 = vadd.f32 %v263_v14, %v262_v13 }
 0x127   : > { %406 = vpush %v264_v15 }
 0x152   : > { %270 = sbr.rel (%p398_p4) target bundleno = 345 (0x159), region = 48 }
 0x158   : > { %s407_s23 = spop %406 }
 0x159 PF: > { %v273_v17 = vld [vmem:[#allocation2] sm:$0x1]  ;;  %v274_v18 = vstv %s407_s23  ;;  %vm276_vm1 = vcmask 0   ;;  %s278_s14 = sld [smem:[#allocation6 + %s731_s18]] }
 0x15a   : > { %v275_v19 = vadd.f32 %v274_v18, %v273_v17 }
 0x15c   : > { %277 = vst.msk [vmem:[#allocation2] sm:$0x1] %vm276_vm1, %v275_v19 }
 0x15f   : > { %p399_p12 = scmp.ne.s32.totalorder %s278_s14, 1 }
 0x160   : > { %s283_s21 = sld [smem:[#allocation4 + %s731_s18]] (!%p399_p12) }
 0x161   : > { %282 = sbr.rel (%p399_p12) target bundleno = 418 (0x1a2), region = 52 }
 0x163   : > { %v284_v20 = vld [vmem:[#allocation2] sm:$0x1] (!%p399_p12) }
 0x166   : > { %s285_s26 = sld [smem:[#allocation7 + %s283_s21]] (!%p399_p12)  ;;  %s290_s29 = scalar_lea.smem (!%p399_p12), [#allocation14], %s283_s21 }
 0x16c   : > { %v286_v21 = vstv %s285_s26 }
 0x16d   : > { %v287_v22 = vmul.f32 %v286_v21, %v284_v20 }
 0x16f   : > { %408 = vpush %v287_v22 }
 0x1a0   : > { %s409_s27 = spop %408 }
 0x1a1   : > { %291 = sst [smem:[%s290_s29]] %s409_s27 }
 0x1a2 PF: > { %p436_p3 = scmp.eq.s32.totalorder %s731_s18, 1  ;;  %s587_s10 = scalar_lea.hbm %s914_s6, 16 }
 0x1a3   : > { %p588_p8 = scmp.ne.s32.totalorder %s914_s6, %s587_s10  ;;  %p593_p13 = scmp.lt.u32.totalorder %s587_s10, %s914_s6 }
 0x1a5   : > { %p589_p10 = pnand %p588_p8, %p436_p3 }
 0x1a7   : > { %p590_p11 = pneg %p589_p10 }
 0x1a9   : > { %p595_p9 = pnand %p593_p13, %p590_p11 }
 0x1ab   : > { %598 = shalt.err (!%p595_p9)
}
 0x1ac   : > { %s658_s9 = smov [#allocation14]  }
 0x1ad   : > { %419 = dma.smem_to_hbm (%p436_p3), %s658_s9, 16, %s914_s6, [#allocation9]  }
 0x1ae   : > { %630 = dma.done.wait (%p436_p3), [#allocation9], 16  }
 0x1af   : > { %632 = vsyncadd (%p436_p3), [#allocation9], 4294967280 }
 0x1b0   : > { %305 = sfence }
 0x1b1 PF: > { %p33_p0 = scmp.ge.s32.totalorder %s734_s19, 4   ;;  %s925_s2 = smov %s639_s15 }
 0x1b2   : > { %s926_s15 = smov %s643_s16  ;;  %s927_s16 = smov %s744_s22 }
 0x1b3   : > { %s928_s17 = smov %s734_s19  ;;  %35 = sbr.rel (!%p33_p0) target bundleno = 40 (0x28), region = 96 }
 0x1ba   :  { %311 = vsyncpa [#allocation8], 1 }
 0x1bb   :  { %313 = vsyncpa [#allocation8 + $0x1], 1 }
 0x1bc   :  { %314 = vsyncpa [#allocation13], 1 }
 0x1bd   :  { %316 = vsyncpa [#allocation13 + $0x1], 1 }
 0x1be   :  { %317 = vsyncpa [#allocation9], 1 }
 0x1bf   :  { %319 = vsyncpa [#allocation9 + $0x1], 1 }
 0x1c0   :  { %320 = vsyncpa [#allocation10], 1 }
 0x1c1   :  { %322 = vsyncpa [#allocation10 + $0x1], 1 }

</bundles_post_ra>
